<compile_context>
chip_gen: v6e
topology: v6e:2x2x1
jax: 0.10.0
libtpu: 0.0.40
codegen_flags: <defaults>
</compile_context>

<pallas_src>
import jax
import jax.numpy as jnp
from jax import lax
from jax.experimental import pallas as pl
from jax.experimental.pallas import tpu as pltpu


def _pick_batch_block(n: int) -> int:
    """Images per grid step: amortize ~0.35us/step overhead, keep >=2 steps."""
    for nb in (8, 4, 2, 1):
        if n % nb == 0 and n // nb >= 2:
            return nb
    return n  # n == 1


def down_kernel(x_ref, w1_ref, w2_ref, o_ref):
    # x_ref : (Nb, 4, Hp, Wp, Cin)  bf16 - 2x2 maxpool candidates on axis 1
    # w1_ref: (9*Cin,  Cmid)        bf16 - conv1 taps flattened (ky, kx, ci)
    # w2_ref: (9*Cmid, Cout_pad)    bf16 - conv2 taps flattened, lane-padded N
    # o_ref : (Nb*Hp*Wp, Cout_pad)  f32  - lane-dense flattened output slab
    nb, _, hp, wp, cin = x_ref.shape
    cmid = w1_ref.shape[1]

    xv = x_ref[...]
    # ---- MaxPool2d(2): elementwise max of the 4 pre-packed candidates (VPU).
    pooled = jnp.maximum(jnp.maximum(xv[:, 0], xv[:, 1]),
                         jnp.maximum(xv[:, 2], xv[:, 3]))       # (Nb,Hp,Wp,Cin)

    def shift(a, off, axis):
        # b[..., i, ...] = a[..., i + off, ...], zero-padded at the borders.
        if off == 0:
            return a
        n = a.shape[axis]
        zshape = list(a.shape)
        zshape[axis] = abs(off)
        zeros = jnp.zeros(zshape, a.dtype)
        idx = [slice(None)] * a.ndim
        if off > 0:
            idx[axis] = slice(off, None)
            return jnp.concatenate([a[tuple(idx)], zeros], axis=axis)
        idx[axis] = slice(0, n + off)
        return jnp.concatenate([zeros, a[tuple(idx)]], axis=axis)

    def im2col3x3(a):
        # (Nb, Hp, Wp, C) -> (Nb*Hp*Wp, 9*C). Tap order (ky, kx, c) matches the
        # row-major reshape of an HWIO (3, 3, C, Co) weight to (9*C, Co).
        taps = []
        for ky in (-1, 0, 1):
            ay = shift(a, ky, axis=1)
            for kx in (-1, 0, 1):
                taps.append(shift(ay, kx, axis=2))
        p = jnp.concatenate(taps, axis=-1)
        return p.reshape(a.shape[0] * a.shape[1] * a.shape[2], 9 * a.shape[3])

    # ---- conv1 (3x3, pad=1, bias=False) as ONE im2col matmul, f32 accumulate.
    p1 = im2col3x3(pooled)                                      # (M, 9*Cin) bf16
    acc1 = jnp.dot(p1, w1_ref[...], preferred_element_type=jnp.float32)
    h1 = jnp.maximum(acc1, 0.0)                                 # ReLU (f32)

    # ---- conv2 (3x3, pad=1, bias=False) as ONE im2col matmul into padded Cout.
    h1b = h1.astype(jnp.bfloat16).reshape(nb, hp, wp, cmid)
    p2 = im2col3x3(h1b)                                         # (M, 9*Cmid) bf16
    acc2 = jnp.dot(p2, w2_ref[...], preferred_element_type=jnp.float32)

    # Lane-dense unmasked store (last dim is a multiple of 128).
    o_ref[...] = jnp.maximum(acc2, 0.0)                         # ReLU (f32)


def down_forward(x_nchw, w1_hwio, w2_hwio):
    """Down.forward: MaxPool2d(2) -> conv3x3 -> ReLU -> conv3x3 -> ReLU.

    x_nchw: (N, Cin, H, W) float32; returns (N, Cout, H//2, W//2) float32.
    """
    N, Cin, H, W = x_nchw.shape
    Hp, Wp = H // 2, W // 2
    Cmid = w1_hwio.shape[-1]
    Cout = w2_hwio.shape[-1]
    Cout_pad = ((Cout + 127) // 128) * 128

    # MaxPool2d(2) floors odd spatial dims, so drop trailing row/col if present.
    x_nchw = x_nchw[:, :, :2 * Hp, :2 * Wp]

    # Pack the 2x2 pooling window onto a leading axis. This is a single fused
    # XLA copy that also performs the unavoidable NCHW->"channels last" layout
    # change and the bf16 cast (halves the HBM->VMEM DMA bytes).
    x_packed = (x_nchw.reshape(N, Cin, Hp, 2, Wp, 2)
                .transpose(0, 3, 5, 2, 4, 1)                 # (N,2,2,Hp,Wp,Cin)
                .reshape(N, 4, Hp, Wp, Cin)
                .astype(jnp.bfloat16))

    # Flatten conv taps into the contraction dim; pad conv2's output channels
    # to a lane multiple so the kernel's output store is unmasked / lane-dense.
    w1_flat = w1_hwio.astype(jnp.bfloat16).reshape(9 * Cin, Cmid)
    w2_flat = w2_hwio.astype(jnp.bfloat16).reshape(9 * Cmid, Cout)
    if Cout_pad != Cout:
        w2_flat = jnp.pad(w2_flat, ((0, 0), (0, Cout_pad - Cout)))

    Nb = _pick_batch_block(N)
    grid = (N // Nb,)
    Mb = Nb * Hp * Wp

    flops = 2 * N * Hp * Wp * 9 * (Cin * Cmid + Cmid * Cout_pad)
    bytes_accessed = (x_packed.size * 2 + w1_flat.size * 2 + w2_flat.size * 2
                      + N * Hp * Wp * Cout_pad * 4)

    out_flat = pl.pallas_call(
        down_kernel,
        out_shape=jax.ShapeDtypeStruct((N * Hp * Wp, Cout_pad), jnp.float32),
        grid=grid,
        in_specs=[
            pl.BlockSpec((Nb, 4, Hp, Wp, Cin), lambda n: (n, 0, 0, 0, 0)),
            pl.BlockSpec((9 * Cin, Cmid), lambda n: (0, 0)),
            pl.BlockSpec((9 * Cmid, Cout_pad), lambda n: (0, 0)),
        ],
        out_specs=pl.BlockSpec((Mb, Cout_pad), lambda n: (n, 0)),
        compiler_params=pltpu.CompilerParams(
            dimension_semantics=("parallel",),
            vmem_limit_bytes=32 * 1024 * 1024,
        ),
        cost_estimate=pl.CostEstimate(flops=flops, transcendentals=0,
                                      bytes_accessed=bytes_accessed),
    )(x_packed, w1_flat, w2_flat)

    # Slice the real channels back out, restore NCHW (single fused XLA copy).
    out = out_flat[:, :Cout].reshape(N, Hp, Wp, Cout)
    return jnp.transpose(out, (0, 3, 1, 2)).astype(jnp.float32)


def down_reference(x_nchw, w1_hwio, w2_hwio):
    """Pure-JAX f32 reference (same semantics as the PyTorch module, norm=None)."""
    x = jnp.transpose(x_nchw, (0, 2, 3, 1))
    pooled = lax.reduce_window(x, -jnp.inf, lax.max,
                               (1, 2, 2, 1), (1, 2, 2, 1), "VALID")
    dn = ("NHWC", "HWIO", "NHWC")
    c1 = lax.conv_general_dilated(pooled, w1_hwio, (1, 1), "SAME",
                                  dimension_numbers=dn)
    r1 = jnp.maximum(c1, 0.0)
    c2 = lax.conv_general_dilated(r1, w2_hwio, (1, 1), "SAME",
                                  dimension_numbers=dn)
    r2 = jnp.maximum(c2, 0.0)
    return jnp.transpose(r2, (0, 3, 1, 2))


if __name__ == "__main__":
    # Small shapes consistent with the module's forward pass.
    N, Cin, H, W = 2, 4, 16, 16
    Cout = 8
    Cmid = Cout  # DoubleConv default: mid_channels = out_channels

    key = jax.random.PRNGKey(0)
    kx, kw1, kw2 = jax.random.split(key, 3)

    x = jax.random.normal(kx, (N, Cin, H, W), dtype=jnp.float32)
    # Deterministic synthetic conv weights (HWIO), no bias (matches bias=False).
    w1 = 0.1 * jax.random.normal(kw1, (3, 3, Cin, Cmid), dtype=jnp.float32)
    w2 = 0.1 * jax.random.normal(kw2, (3, 3, Cmid, Cout), dtype=jnp.float32)

    out = jax.block_until_ready(jax.jit(down_forward)(x, w1, w2))
    ref = jax.block_until_ready(down_reference(x, w1, w2))

    assert out.shape == (N, Cout, H // 2, W // 2), out.shape
    # Kernel uses bf16 MXU operands (f32 accumulation) vs the f32 reference,
    # so the tolerance is loose-but-meaningful (outputs are O(0.3)).
    max_err = float(jnp.max(jnp.abs(out - ref)))
    assert jnp.allclose(out, ref, rtol=3e-2, atol=3e-2), f"mismatch: {max_err}"

    print("KERNEL_OK")
</pallas_src>

<mosaic_0001>
module attributes {stable_mosaic.version = 11 : i64} {
  func.func @down_kernel(%arg0: i32, %arg1: memref<1x4x8x8x4xbf16, #tpu.memory_space<vmem>>, %arg2: memref<36x8xbf16, #tpu.memory_space<vmem>>, %arg3: memref<72x128xbf16, #tpu.memory_space<vmem>>, %arg4: memref<64x128xf32, #tpu.memory_space<vmem>>) attributes {dimension_semantics = [#tpu.dimension_semantics<parallel>], iteration_bounds = array<i64: 2>, scalar_prefetch = 0 : i64, scratch_operands = 0 : i64, tpu.core_type = #tpu.core_type<tc>, window_params = [{transform_indices = @transform_0, window_bounds = array<i64: 1, 4, 8, 8, 4>}, {pipeline_mode = #tpu.pipeline_mode<synchronous>, transform_indices = @transform_1, window_bounds = array<i64: 36, 8>}, {pipeline_mode = #tpu.pipeline_mode<synchronous>, transform_indices = @transform_2, window_bounds = array<i64: 72, 128>}, {transform_indices = @transform_3, window_bounds = array<i64: 64, 128>}]} {
    %c0 = arith.constant 0 : index
    %c0_0 = arith.constant 0 : index
    %c0_1 = arith.constant 0 : index
    %c0_2 = arith.constant 0 : index
    %c0_3 = arith.constant 0 : index
    %0 = vector.load %arg1[%c0, %c0_0, %c0_1, %c0_2, %c0_3] : memref<1x4x8x8x4xbf16, #tpu.memory_space<vmem>>, vector<1x4x8x8x4xbf16>
    %1 = vector.extract_strided_slice %0 {offsets = [0, 0, 0, 0, 0], sizes = [1, 1, 8, 8, 4], strides = [1, 1, 1, 1, 1]} : vector<1x4x8x8x4xbf16> to vector<1x1x8x8x4xbf16>
    %2 = vector.shape_cast %1 : vector<1x1x8x8x4xbf16> to vector<1x8x8x4xbf16>
    %3 = vector.extract_strided_slice %0 {offsets = [0, 1, 0, 0, 0], sizes = [1, 1, 8, 8, 4], strides = [1, 1, 1, 1, 1]} : vector<1x4x8x8x4xbf16> to vector<1x1x8x8x4xbf16>
    %4 = vector.shape_cast %3 : vector<1x1x8x8x4xbf16> to vector<1x8x8x4xbf16>
    %5 = arith.maximumf %2, %4 : vector<1x8x8x4xbf16>
    %6 = vector.extract_strided_slice %0 {offsets = [0, 2, 0, 0, 0], sizes = [1, 1, 8, 8, 4], strides = [1, 1, 1, 1, 1]} : vector<1x4x8x8x4xbf16> to vector<1x1x8x8x4xbf16>
    %7 = vector.shape_cast %6 : vector<1x1x8x8x4xbf16> to vector<1x8x8x4xbf16>
    %8 = vector.extract_strided_slice %0 {offsets = [0, 3, 0, 0, 0], sizes = [1, 1, 8, 8, 4], strides = [1, 1, 1, 1, 1]} : vector<1x4x8x8x4xbf16> to vector<1x1x8x8x4xbf16>
    %9 = vector.shape_cast %8 : vector<1x1x8x8x4xbf16> to vector<1x8x8x4xbf16>
    %10 = arith.maximumf %7, %9 : vector<1x8x8x4xbf16>
    %11 = arith.maximumf %5, %10 : vector<1x8x8x4xbf16>
    %cst = arith.constant 0.000000e+00 : bf16
    %12 = vector.broadcast %cst : bf16 to vector<1x1x8x4xbf16>
    %13 = vector.extract_strided_slice %11 {offsets = [0, 0, 0, 0], sizes = [1, 7, 8, 4], strides = [1, 1, 1, 1]} : vector<1x8x8x4xbf16> to vector<1x7x8x4xbf16>
    %14 = tpu.concatenate %12, %13 in 1 : vector<1x1x8x4xbf16>, vector<1x7x8x4xbf16> -> vector<1x8x8x4xbf16>
    %cst_4 = arith.constant 0.000000e+00 : bf16
    %15 = vector.broadcast %cst_4 : bf16 to vector<1x8x1x4xbf16>
    %16 = vector.extract_strided_slice %14 {offsets = [0, 0, 0, 0], sizes = [1, 8, 7, 4], strides = [1, 1, 1, 1]} : vector<1x8x8x4xbf16> to vector<1x8x7x4xbf16>
    %17 = tpu.concatenate %15, %16 in 2 : vector<1x8x1x4xbf16>, vector<1x8x7x4xbf16> -> vector<1x8x8x4xbf16>
    %cst_5 = arith.constant 0.000000e+00 : bf16
    %18 = vector.broadcast %cst_5 : bf16 to vector<1x8x1x4xbf16>
    %19 = vector.extract_strided_slice %14 {offsets = [0, 0, 1, 0], sizes = [1, 8, 7, 4], strides = [1, 1, 1, 1]} : vector<1x8x8x4xbf16> to vector<1x8x7x4xbf16>
    %20 = tpu.concatenate %19, %18 in 2 : vector<1x8x7x4xbf16>, vector<1x8x1x4xbf16> -> vector<1x8x8x4xbf16>
    %cst_6 = arith.constant 0.000000e+00 : bf16
    %21 = vector.broadcast %cst_6 : bf16 to vector<1x8x1x4xbf16>
    %22 = vector.extract_strided_slice %11 {offsets = [0, 0, 0, 0], sizes = [1, 8, 7, 4], strides = [1, 1, 1, 1]} : vector<1x8x8x4xbf16> to vector<1x8x7x4xbf16>
    %23 = tpu.concatenate %21, %22 in 2 : vector<1x8x1x4xbf16>, vector<1x8x7x4xbf16> -> vector<1x8x8x4xbf16>
    %cst_7 = arith.constant 0.000000e+00 : bf16
    %24 = vector.broadcast %cst_7 : bf16 to vector<1x8x1x4xbf16>
    %25 = vector.extract_strided_slice %11 {offsets = [0, 0, 1, 0], sizes = [1, 8, 7, 4], strides = [1, 1, 1, 1]} : vector<1x8x8x4xbf16> to vector<1x8x7x4xbf16>
    %26 = tpu.concatenate %25, %24 in 2 : vector<1x8x7x4xbf16>, vector<1x8x1x4xbf16> -> vector<1x8x8x4xbf16>
    %cst_8 = arith.constant 0.000000e+00 : bf16
    %27 = vector.broadcast %cst_8 : bf16 to vector<1x1x8x4xbf16>
    %28 = vector.extract_strided_slice %11 {offsets = [0, 1, 0, 0], sizes = [1, 7, 8, 4], strides = [1, 1, 1, 1]} : vector<1x8x8x4xbf16> to vector<1x7x8x4xbf16>
    %29 = tpu.concatenate %28, %27 in 1 : vector<1x7x8x4xbf16>, vector<1x1x8x4xbf16> -> vector<1x8x8x4xbf16>
    %cst_9 = arith.constant 0.000000e+00 : bf16
    %30 = vector.broadcast %cst_9 : bf16 to vector<1x8x1x4xbf16>
    %31 = vector.extract_strided_slice %29 {offsets = [0, 0, 0, 0], sizes = [1, 8, 7, 4], strides = [1, 1, 1, 1]} : vector<1x8x8x4xbf16> to vector<1x8x7x4xbf16>
    %32 = tpu.concatenate %30, %31 in 2 : vector<1x8x1x4xbf16>, vector<1x8x7x4xbf16> -> vector<1x8x8x4xbf16>
    %cst_10 = arith.constant 0.000000e+00 : bf16
    %33 = vector.broadcast %cst_10 : bf16 to vector<1x8x1x4xbf16>
    %34 = vector.extract_strided_slice %29 {offsets = [0, 0, 1, 0], sizes = [1, 8, 7, 4], strides = [1, 1, 1, 1]} : vector<1x8x8x4xbf16> to vector<1x8x7x4xbf16>
    %35 = tpu.concatenate %34, %33 in 2 : vector<1x8x7x4xbf16>, vector<1x8x1x4xbf16> -> vector<1x8x8x4xbf16>
    %36 = tpu.concatenate %17, %14, %20, %23, %11, %26, %32, %29, %35 in 3 : vector<1x8x8x4xbf16>, vector<1x8x8x4xbf16>, vector<1x8x8x4xbf16>, vector<1x8x8x4xbf16>, vector<1x8x8x4xbf16>, vector<1x8x8x4xbf16>, vector<1x8x8x4xbf16>, vector<1x8x8x4xbf16>, vector<1x8x8x4xbf16> -> vector<1x8x8x36xbf16>
    %37 = vector.shape_cast %36 : vector<1x8x8x36xbf16> to vector<64x36xbf16>
    %c0_11 = arith.constant 0 : index
    %c0_12 = arith.constant 0 : index
    %38 = vector.load %arg2[%c0_11, %c0_12] : memref<36x8xbf16, #tpu.memory_space<vmem>>, vector<36x8xbf16>
    %cst_13 = arith.constant dense<0.000000e+00> : vector<64x8xf32>
    %39 = tpu.matmul %37, %38, %cst_13 {dimension_numbers = #tpu.dot_dimension_numbers<[1], [0], [0], [1], [0, 0, 1, 1], [], []>} : vector<64x36xbf16>, vector<36x8xbf16>, vector<64x8xf32> -> vector<64x8xf32>
    %cst_14 = arith.constant 0.000000e+00 : f32
    %40 = vector.broadcast %cst_14 : f32 to vector<64x8xf32>
    %41 = arith.maximumf %39, %40 : vector<64x8xf32>
    %42 = arith.truncf %41 : vector<64x8xf32> to vector<64x8xbf16>
    %43 = vector.shape_cast %42 : vector<64x8xbf16> to vector<1x8x8x8xbf16>
    %cst_15 = arith.constant 0.000000e+00 : bf16
    %44 = vector.broadcast %cst_15 : bf16 to vector<1x1x8x8xbf16>
    %45 = vector.extract_strided_slice %43 {offsets = [0, 0, 0, 0], sizes = [1, 7, 8, 8], strides = [1, 1, 1, 1]} : vector<1x8x8x8xbf16> to vector<1x7x8x8xbf16>
    %46 = tpu.concatenate %44, %45 in 1 : vector<1x1x8x8xbf16>, vector<1x7x8x8xbf16> -> vector<1x8x8x8xbf16>
    %cst_16 = arith.constant 0.000000e+00 : bf16
    %47 = vector.broadcast %cst_16 : bf16 to vector<1x8x1x8xbf16>
    %48 = vector.extract_strided_slice %46 {offsets = [0, 0, 0, 0], sizes = [1, 8, 7, 8], strides = [1, 1, 1, 1]} : vector<1x8x8x8xbf16> to vector<1x8x7x8xbf16>
    %49 = tpu.concatenate %47, %48 in 2 : vector<1x8x1x8xbf16>, vector<1x8x7x8xbf16> -> vector<1x8x8x8xbf16>
    %cst_17 = arith.constant 0.000000e+00 : bf16
    %50 = vector.broadcast %cst_17 : bf16 to vector<1x8x1x8xbf16>
    %51 = vector.extract_strided_slice %46 {offsets = [0, 0, 1, 0], sizes = [1, 8, 7, 8], strides = [1, 1, 1, 1]} : vector<1x8x8x8xbf16> to vector<1x8x7x8xbf16>
    %52 = tpu.concatenate %51, %50 in 2 : vector<1x8x7x8xbf16>, vector<1x8x1x8xbf16> -> vector<1x8x8x8xbf16>
    %cst_18 = arith.constant 0.000000e+00 : bf16
    %53 = vector.broadcast %cst_18 : bf16 to vector<1x8x1x8xbf16>
    %54 = vector.extract_strided_slice %43 {offsets = [0, 0, 0, 0], sizes = [1, 8, 7, 8], strides = [1, 1, 1, 1]} : vector<1x8x8x8xbf16> to vector<1x8x7x8xbf16>
    %55 = tpu.concatenate %53, %54 in 2 : vector<1x8x1x8xbf16>, vector<1x8x7x8xbf16> -> vector<1x8x8x8xbf16>
    %cst_19 = arith.constant 0.000000e+00 : bf16
    %56 = vector.broadcast %cst_19 : bf16 to vector<1x8x1x8xbf16>
    %57 = vector.extract_strided_slice %43 {offsets = [0, 0, 1, 0], sizes = [1, 8, 7, 8], strides = [1, 1, 1, 1]} : vector<1x8x8x8xbf16> to vector<1x8x7x8xbf16>
    %58 = tpu.concatenate %57, %56 in 2 : vector<1x8x7x8xbf16>, vector<1x8x1x8xbf16> -> vector<1x8x8x8xbf16>
    %cst_20 = arith.constant 0.000000e+00 : bf16
    %59 = vector.broadcast %cst_20 : bf16 to vector<1x1x8x8xbf16>
    %60 = vector.extract_strided_slice %43 {offsets = [0, 1, 0, 0], sizes = [1, 7, 8, 8], strides = [1, 1, 1, 1]} : vector<1x8x8x8xbf16> to vector<1x7x8x8xbf16>
    %61 = tpu.concatenate %60, %59 in 1 : vector<1x7x8x8xbf16>, vector<1x1x8x8xbf16> -> vector<1x8x8x8xbf16>
    %cst_21 = arith.constant 0.000000e+00 : bf16
    %62 = vector.broadcast %cst_21 : bf16 to vector<1x8x1x8xbf16>
    %63 = vector.extract_strided_slice %61 {offsets = [0, 0, 0, 0], sizes = [1, 8, 7, 8], strides = [1, 1, 1, 1]} : vector<1x8x8x8xbf16> to vector<1x8x7x8xbf16>
    %64 = tpu.concatenate %62, %63 in 2 : vector<1x8x1x8xbf16>, vector<1x8x7x8xbf16> -> vector<1x8x8x8xbf16>
    %cst_22 = arith.constant 0.000000e+00 : bf16
    %65 = vector.broadcast %cst_22 : bf16 to vector<1x8x1x8xbf16>
    %66 = vector.extract_strided_slice %61 {offsets = [0, 0, 1, 0], sizes = [1, 8, 7, 8], strides = [1, 1, 1, 1]} : vector<1x8x8x8xbf16> to vector<1x8x7x8xbf16>
    %67 = tpu.concatenate %66, %65 in 2 : vector<1x8x7x8xbf16>, vector<1x8x1x8xbf16> -> vector<1x8x8x8xbf16>
    %68 = tpu.concatenate %49, %46, %52, %55, %43, %58, %64, %61, %67 in 3 : vector<1x8x8x8xbf16>, vector<1x8x8x8xbf16>, vector<1x8x8x8xbf16>, vector<1x8x8x8xbf16>, vector<1x8x8x8xbf16>, vector<1x8x8x8xbf16>, vector<1x8x8x8xbf16>, vector<1x8x8x8xbf16>, vector<1x8x8x8xbf16> -> vector<1x8x8x72xbf16>
    %69 = vector.shape_cast %68 : vector<1x8x8x72xbf16> to vector<64x72xbf16>
    %c0_23 = arith.constant 0 : index
    %c0_24 = arith.constant 0 : index
    %70 = vector.load %arg3[%c0_23, %c0_24] : memref<72x128xbf16, #tpu.memory_space<vmem>>, vector<72x128xbf16>
    %cst_25 = arith.constant dense<0.000000e+00> : vector<64x128xf32>
    %71 = tpu.matmul %69, %70, %cst_25 {dimension_numbers = #tpu.dot_dimension_numbers<[1], [0], [0], [1], [0, 0, 1, 1], [], []>} : vector<64x72xbf16>, vector<72x128xbf16>, vector<64x128xf32> -> vector<64x128xf32>
    %cst_26 = arith.constant 0.000000e+00 : f32
    %72 = vector.broadcast %cst_26 : f32 to vector<64x128xf32>
    %73 = arith.maximumf %71, %72 : vector<64x128xf32>
    %c0_27 = arith.constant 0 : index
    %c0_28 = arith.constant 0 : index
    %74 = vector.load %arg4[%c0_27, %c0_28] : memref<64x128xf32, #tpu.memory_space<vmem>>, vector<64x128xf32>
    tpu.vector_store %arg4[%c0_27, %c0_28], %73 {strides = array<i32>} : memref<64x128xf32, #tpu.memory_space<vmem>>, vector<64x128xf32>,
    return
  }
  func.func @transform_0(%arg0: i32) -> (i32, i32, i32, i32, i32) {
    %c0_i32 = arith.constant 0 : i32
    %c0_i32_0 = arith.constant 0 : i32
    %c0_i32_1 = arith.constant 0 : i32
    %c0_i32_2 = arith.constant 0 : i32
    %c0_i32_3 = arith.constant 0 : i32
    return %arg0, %c0_i32, %c0_i32_0, %c0_i32_1, %c0_i32_2 : i32, i32, i32, i32, i32
  }
  func.func @transform_1(%arg0: i32) -> (i32, i32) {
    %c0_i32 = arith.constant 0 : i32
    %c0_i32_0 = arith.constant 0 : i32
    %c0_i32_1 = arith.constant 0 : i32
    return %c0_i32, %c0_i32_0 : i32, i32
  }
  func.func @transform_2(%arg0: i32) -> (i32, i32) {
    %c0_i32 = arith.constant 0 : i32
    %c0_i32_0 = arith.constant 0 : i32
    %c0_i32_1 = arith.constant 0 : i32
    return %c0_i32, %c0_i32_0 : i32, i32
  }
  func.func @transform_3(%arg0: i32) -> (i32, i32) {
    %c0_i32 = arith.constant 0 : i32
    %c0_i32_0 = arith.constant 0 : i32
    return %arg0, %c0_i32 : i32, i32
  }
}

</mosaic_0001>

<bundles_post_ra>
// kernel: down_forward.1
= control target key start
LH: loop header
LB: loop body
LE: loop exit
PB: predicated region body
PF: predicated region fallthrough
CT: control target
= control target key end

     0   :  { %s1713_s12 = smov 0   ;;  %s2459_s0 = inlined_call_operand.vmem [shape: bf16[2,4,8,8,4], index: 0, kind: input, shape index: {}]   ;;  %s2460_s1 = inlined_call_operand.vmem [shape: bf16[36,8], index: 1, kind: input, shape index: {}]   ;;  %s2461_s2 = inlined_call_operand.vmem [shape: bf16[72,128], index: 2, kind: input, shape index: {}]   ;;  %s2462_s3 = inlined_call_operand.vmem [shape: f32[128,128], index: 3, kind: output, shape index: {}]  }
   0x1 LB: > { %s1719_s13 = sadd.s32 4294967295, %s1678_s12   ;;  %p1536_p0 = scmp.ge.s32.totalorder %s1678_s12, 1  ;;  %s1678_s12 = sphi %s1713_s12, %s13_s12  }
   0x2   : > { %p137_p1 = scmp.lt.s32.totalorder %s1678_s12, 3 }
   0x4   : > { %p138_p2 = pnand %p1536_p0, %p137_p1 }
   0x5   : > { %s1681_s14 = smov (!%p138_p2), 4   ;;  %p161_p3 = scmp.lt.s32.totalorder (!%p138_p2), %s1719_s13, 1 }
   0x6   : > { %141 = sbr.rel (%p138_p2) target bundleno = 866 (0x362), region = 32  ;;  %s1682_s16 = smov (!%p138_p2), 8  }
   0x7   : > { %s1683_s21 = smov (!%p138_p2), 12   ;;  %s1684_s22 = smov (!%p138_p2), 16  }
   0x8   : > { %s1685_s23 = smov (!%p138_p2), 20   ;;  %s1686_s24 = smov (!%p138_p2), 24  }
   0x9   : > { %s1687_s27 = smov (!%p138_p2), 28   ;;  %s1688_s5 = smov (!%p138_p2), 32  }
   0xa   : > { %s1689_s6 = smov (!%p138_p2), 48   ;;  %s1690_s7 = smov (!%p138_p2), 56  }
   0xb   : > { %vm328_vm0 = vcmask 1043456   ;;  %vm329_vm1 = vsmask.f32 3328  ;;  %v1680_v0 = vmov 0   ;;  %s162_s15 = scalar_select %p161_p3, %s1719_s13, 1  ;;  %vm293_vm3 = vcmask 1040384  }
   0xc   : > { %483 = vrot.lane.b32.xlu0 %v1680_v0, %s1681_s14  ;;  %v304_v1 = vrot.slane %v1680_v0, 1  ;;  %vm1727_vm2 = vmand %vm328_vm0, %vm329_vm1  ;;  %vm294_vm4 = vsmask.f32 256  ;;  %vm834_vm6 = vcmask 1041408   ;;  %vm637_vm7 = vcmask 31744   ;;  %s1691_s8 = smov 64  }
   0xd   : > { %s1584_s17 = sshll.u32 %s162_s15, 7  ;;  %vm1804_vm5 = vmand %vm293_vm3, %vm294_vm4  ;;  %vm662_vm8 = vcmask 64512   ;;  %vm679_vm9 = vcmask 97280   ;;  %vm696_vm10 = vcmask 130048   ;;  %vm713_vm11 = vcmask 162816   ;;  %s1692_s9 = smov 40  }
   0xe   : > { %v1734_v3 = vsel %vm1727_vm2, %v304_v1, 0  ;;  %s1742_s20 = scalar_lea.vmem %s2459_s0, %s1584_s17  ;;  %vm730_vm12 = vcmask 195584   ;;  %vm747_vm13 = vcmask 228352   ;;  %vm764_vm14 = vcmask 261120  }
   0xf   : > { %v174_v4 = vld [vmem:[%s1742_s20 + $0x4] sm:$0xf]  ;;  %v173_v9 = vld [vmem:[%s1742_s20] sm:$0xf]  ;;  %v175_v15 = vld [vmem:[%s1742_s20 + $0x8] sm:$0xf] }
  0x10   : > { %507 = vrot.lane.b32.xlu0 %v1734_v3, %s1682_s16  ;;  %v182_v5 = vld [vmem:[%s1742_s20 + $0x24] sm:$0xf]  ;;  %v181_v10 = vld [vmem:[%s1742_s20 + $0x20] sm:$0xf]  ;;  %v183_v17 = vld [vmem:[%s1742_s20 + $0x28] sm:$0xf] }
  0x11   : > { %v190_v6 = vld [vmem:[%s1742_s20 + $0x44] sm:$0xf]  ;;  %v206_v8 = vmax.bf16 %v182_v5, %v174_v4  ;;  %v189_v12 = vld [vmem:[%s1742_s20 + $0x40] sm:$0xf]  ;;  %v205_v14 = vmax.bf16 %v181_v10, %v173_v9  ;;  %v191_v18 = vld [vmem:[%s1742_s20 + $0x48] sm:$0xf]  ;;  %v207_v21 = vmax.bf16 %v183_v17, %v175_v15 }
  0x12   : > { %v198_v7 = vld [vmem:[%s1742_s20 + $0x64] sm:$0xf]  ;;  %v197_v13 = vld [vmem:[%s1742_s20 + $0x60] sm:$0xf]  ;;  %v199_v19 = vld [vmem:[%s1742_s20 + $0x68] sm:$0xf] }
  0x13   : > { %v214_v11 = vmax.bf16 %v198_v7, %v190_v6  ;;  %v213_v16 = vmax.bf16 %v197_v13, %v189_v12  ;;  %v215_v22 = vmax.bf16 %v199_v19, %v191_v18  ;;  %v176_v24 = vld [vmem:[%s1742_s20 + $0xc] sm:$0xf]  ;;  %v177_v7 = vld [vmem:[%s1742_s20 + $0x10] sm:$0xf]  ;;  %vm821_vm15 = vcmask 293888  }
  0x14   : > { %v184_v25 = vld [vmem:[%s1742_s20 + $0x2c] sm:$0xf]  ;;  %v185_v10 = vld [vmem:[%s1742_s20 + $0x30] sm:$0xf]  ;;  %vm1271_vm1 = vcmask 392192   ;;  %vm1305_vm3 = vcmask 523264  }
  0x15   : > { %v1756_v20 = vmax.bf16 %v214_v11, %v206_v8  ;;  %v1758_v23 = vmax.bf16 %v213_v16, %v205_v14  ;;  %v1764_v26 = vmax.bf16 %v215_v22, %v207_v21  ;;  %v192_v29 = vld [vmem:[%s1742_s20 + $0x4c] sm:$0xf]  ;;  %v208_v38 = vmax.bf16 %v184_v25, %v176_v24  ;;  %v193_v11 = vld [vmem:[%s1742_s20 + $0x50] sm:$0xf] }
  0x16   : > { %v200_v30 = vld [vmem:[%s1742_s20 + $0x6c] sm:$0xf]  ;;  %v201_v12 = vld [vmem:[%s1742_s20 + $0x70] sm:$0xf]  ;;  %v209_v16 = vmax.bf16 %v185_v10, %v177_v7  ;;  %vm1378_vm4 = vcmask 588800  }
  0x17   : > { %487 = vrot.lane.b32.xlu1 %v1756_v20, %s1681_s14  ;;  %v244_v27 = vshrl.u32 %v1756_v20, 16  ;;  %v247_v28 = vshll.u32 %v1756_v20, 16  ;;  %485 = vrot.lane.b32.xlu0 %v1758_v23, %s1681_s14  ;;  %v237_v31 = vshrl.u32 %v1758_v23, 16  ;;  %v240_v32 = vshll.u32 %v1758_v23, 16 }
  0x18   : > { %v1541_v33 = vcombine.low %v1758_v23, %v1758_v23  ;;  %v1778_v34 = vcombine.low %v1756_v20, %v1756_v20  ;;  %v251_v36 = vshrl.u32 %v1764_v26, 16  ;;  %v254_v37 = vshll.u32 %v1764_v26, 16 }
  0x19   : > { %v308_v35 = vrot.slane %v247_v28, 1  ;;  %v306_v39 = vrot.slane %v240_v32, 1  ;;  %v216_v42 = vmax.bf16 %v200_v30, %v192_v29  ;;  %v1794_v45 = vcombine.low %v1764_v26, %v1764_v26 }
  0x1a   : > { %v364_v40 = vshrl.u32 %v1541_v33, 16  ;;  %v367_v41 = vshll.u32 %v1541_v33, 16  ;;  %v310_v44 = vrot.slane %v254_v37, 1  ;;  %v371_v48 = vshrl.u32 %v1778_v34, 16 }
  0x1b   : > { %489 = vrot.lane.b32.xlu1 %v1764_v26, %s1681_s14  ;;  %v309_v43 = vor.u32 %v308_v35, %v244_v27  ;;  %v307_v46 = vor.u32 %v306_v39, %v237_v31  ;;  %v374_v49 = vshll.u32 %v1778_v34, 16  ;;  %v378_v53 = vshrl.u32 %v1794_v45, 16 }
  0x1c   : > { %v366_v47 = vrot.slane %v364_v40, 7  ;;  %v311_v52 = vor.u32 %v310_v44, %v251_v36  ;;  %v381_v54 = vshll.u32 %v1794_v45, 16  ;;  %v373_v57 = vrot.slane %v371_v48, 7  ;;  %v194_v44 = vld [vmem:[%s1742_s20 + $0x54] sm:$0xf] }
  0x1d   : > { %v333_v50 = vsel %vm1727_vm2, %v309_v43, 0  ;;  %v332_v55 = vsel %vm1727_vm2, %v307_v46, 0  ;;  %v1815_v58 = vmax.bf16 %v216_v42, %v208_v38  ;;  %v380_v59 = vrot.slane %v378_v53, 7  ;;  %v186_v43 = vld [vmem:[%s1742_s20 + $0x34] sm:$0xf] }
  0x1e   : > { %511 = vrot.lane.b32.xlu0 %v333_v50, %s1682_s16  ;;  %v369_v56 = vor.u32 %v367_v41, %v366_v47  ;;  %v334_v61 = vsel %vm1727_vm2, %v311_v52, 0  ;;  %v376_v62 = vor.u32 %v374_v49, %v373_v57  ;;  %v435_v14 = vrot.slane %v367_v41, 1  ;;  %v202_v46 = vld [vmem:[%s1742_s20 + $0x74] sm:$0xf]  ;;  %v179_v50 = vld [vmem:[%s1742_s20 + $0x18] sm:$0xf] }
  0x1f   : > { %509 = vrot.lane.b32.xlu1 %v332_v55, %s1682_s16  ;;  %v1824_v63 = vcombine.low %v1815_v58, %v1815_v58  ;;  %v383_v1 = vor.u32 %v381_v54, %v380_v59  ;;  %v217_v17 = vmax.bf16 %v201_v12, %v193_v11  ;;  %v439_v19 = vrot.slane %v381_v54, 1  ;;  %v187_v52 = vld [vmem:[%s1742_s20 + $0x38] sm:$0xf]  ;;  %v1665_v11 = vld [vmem:[%s2460_s1 + $0x8] sm:$0xff]  }
  0x20   : > { %v427_v60 = vsel %vm1804_vm5, 0, %v369_v56  ;;  %v428_v8 = vsel %vm1804_vm5, 0, %v376_v62  ;;  %v436_v18 = vor.u32 %v435_v14, %v364_v40  ;;  %v437_v21 = vrot.slane %v374_v49, 1  ;;  %v195_v55 = vld [vmem:[%s1742_s20 + $0x58] sm:$0xf] }
  0x21   : > { %v385_v4 = vshrl.u32 %v1824_v63, 16  ;;  %v388_v5 = vshll.u32 %v1824_v63, 16  ;;  %v1832_v6 = vsel %vm1804_vm5, 0, %v383_v1  ;;  %v1847_v22 = vmax.bf16 %v217_v17, %v209_v16  ;;  %v203_v56 = vld [vmem:[%s1742_s20 + $0x78] sm:$0xf]  ;;  %v1666_v16 = vld [vmem:[%s2460_s1] sm:$0xff]  }
  0x22   : > { %531 = vrot.lane.b32.xlu0 %v427_v60, %s1683_s21  ;;  %v246_v24 = vrot.slane %v244_v27, 7  ;;  %v459_v25 = vsel %vm1727_vm2, %v436_v18, 0  ;;  %v440_v29 = vor.u32 %v439_v19, %v378_v53  ;;  %v438_v30 = vor.u32 %v437_v21, %v371_v48  ;;  %v180_v19 = vld [vmem:[%s1742_s20 + $0x1c] sm:$0xf] }
  0x23   : > { %513 = vrot.lane.b32.xlu1 %v334_v61, %s1682_s16  ;;  %v387_v9 = vrot.slane %v385_v4, 7  ;;  %v253_v35 = vrot.slane %v251_v36, 7  ;;  %v441_v27 = vrot.slane %v388_v5, 1  ;;  %v1863_v38 = vcombine.low %v1847_v22, %v1847_v22  ;;  %v188_v21 = vld [vmem:[%s1742_s20 + $0x3c] sm:$0xf] }
  0x24   : > { %v1868_v39 = vor.u32 %v247_v28, %v246_v24  ;;  %v460_v36 = vsel %vm1727_vm2, %v438_v30, 0  ;;  %v178_v28 = vld [vmem:[%s1742_s20 + $0x14] sm:$0xf]  ;;  %v218_v48 = vmax.bf16 %v202_v46, %v194_v44  ;;  %v261_v54 = vshll.u32 %v1815_v58, 16  ;;  %v204_v24 = vld [vmem:[%s1742_s20 + $0x7c] sm:$0xf] }
  0x25   : > { %v390_v13 = vor.u32 %v388_v5, %v387_v9  ;;  %v442_v40 = vor.u32 %v441_v27, %v385_v4  ;;  %v392_v41 = vshrl.u32 %v1863_v38, 16  ;;  %v1885_v20 = vor.u32 %v254_v37, %v253_v35  ;;  %v1664_v4 = vld [vmem:[%s2460_s1 + $0x10] ss:$0 sps:$4 sm:$0x33]  }
  0x26   : > { %535 = vrot.lane.b32.xlu0 %v1832_v6, %s1683_s21  ;;  %v258_v37 = vshrl.u32 %v1815_v58, 16  ;;  %v210_v47 = vmax.bf16 %v186_v43, %v178_v28  ;;  %v265_v57 = vshrl.u32 %v1847_v22, 16  ;;  %v211_v61 = vmax.bf16 %v187_v52, %v179_v50  ;;  %1641 = vmatprep.subr.msk.bf16.mxu0 %vm834_vm6, %v1664_v4 }
  0x27   : > { %533 = vrot.lane.b32.xlu1 %v428_v8, %s1683_s21  ;;  %v430_v15 = vsel %vm1804_vm5, 0, %v390_v13  ;;  %v1896_v23 = vsel %vm1727_vm2, %v442_v40, 0  ;;  %v394_v26 = vrot.slane %v392_v41, 7  ;;  %v219_v62 = vmax.bf16 %v203_v56, %v195_v55 }
  0x28   : > { %v260_v49 = vrot.slane %v258_v37, 7  ;;  %v226_v59 = vmax.bf16 %v218_v48, %v210_v47  ;;  %v267_v1 = vrot.slane %v265_v57, 7  ;;  %v836_v9 = vsel %vm834_vm6, %v1664_v4, 0 }
  0x29   : > { %1610 = vmatpush3.bf16.msra.mxu0 %v836_v9  ;;  %v227_v10 = vmax.bf16 %v219_v62, %v211_v61  ;;  %v212_v30 = vmax.bf16 %v188_v21, %v180_v19  ;;  %v2013_v9 = vcombine.low %v1680_v0, %v1680_v0 }
  0x2a   : > { %547 = vrot.lane.b32.xlu0 %v1541_v33, %s1684_s22  ;;  %v239_v33 = vrot.slane %v237_v31, 7  ;;  %v1874_v31 = vsel %vm1727_vm2, %v440_v29, 0  ;;  %v1914_v60 = vor.u32 %v261_v54, %v260_v49  ;;  %v272_v7 = vshrl.u32 %v226_v59, 16  ;;  %1611 = vmatprep.subr.bf16.mxu0 %v1665_v11 }
  0x2b   : > { %537 = vrot.lane.b32.xlu1 %v430_v15, %s1683_s21  ;;  %v275_v13 = vshll.u32 %v226_v59, 16  ;;  %v279_v14 = vshrl.u32 %v227_v10, 16  ;;  %v282_v17 = vshll.u32 %v227_v10, 16  ;;  %v1967_v40 = vcombine.low %v227_v10, %v227_v10 }
  0x2c   : > { %v1881_v42 = vor.u32 %v240_v32, %v239_v33  ;;  %v395_v32 = vshll.u32 %v1863_v38, 16  ;;  %v1971_v28 = vcombine.low %v226_v59, %v226_v59 }
  0x2d   : > { %1612 = vmatpush3.bf16.msra.mxu0 %v1665_v11  ;;  %v316_v27 = vrot.slane %v275_v13, 1  ;;  %v406_v46 = vshrl.u32 %v1967_v40, 16 }
  0x2e   : > { %551 = vrot.lane.b32.xlu0 %v1794_v45, %s1684_s22  ;;  %v397_v53 = vor.u32 %v395_v32, %v394_v26  ;;  %1613 = vmatprep.subr.bf16.mxu0 %v1666_v16  ;;  %v443_v18 = vrot.slane %v395_v32, 1  ;;  %v399_v26 = vshrl.u32 %v1971_v28, 16  ;;  %v402_v52 = vshll.u32 %v1971_v28, 16 }
  0x2f   : > { %549 = vrot.lane.b32.xlu1 %v1778_v34, %s1684_s22  ;;  %v317_v44 = vor.u32 %v316_v27, %v272_v7  ;;  %v408_v48 = vrot.slane %v406_v46, 7 }
  0x30   : > { %v1925_v5 = vsel %vm1804_vm5, 0, %v397_v53  ;;  %v444_v29 = vor.u32 %v443_v18, %v392_v41  ;;  %v401_v50 = vrot.slane %v399_v26, 7 }
  0x31   : > { %1614 = vmatpush3.bf16.msra.mxu0 %v1666_v16 }
  0x32   : > { %571 = vrot.lane.b32.xlu0 %v459_v25, %s1685_s23  ;;  %v312_v25 = vrot.slane %v261_v54, 1  ;;  %v404_v56 = vor.u32 %v402_v52, %v401_v50  ;;  %v232_v50 = vrot.slane %v1680_v0, 7 }
  0x33   : > { %553 = vrot.lane.b32.xlu1 %v1824_v63, %s1684_s22 }
  0x34   : > { %v313_v35 = vor.u32 %v312_v25, %v258_v37  ;;  %v337_v37 = vsel %vm1727_vm2, %v317_v44, 0  ;;  %v432_v62 = vsel %vm1804_vm5, 0, %v404_v56 }
  0x36   : > { %575 = vrot.lane.b32.xlu0 %v1874_v31, %s1685_s23  ;;  %v335_v43 = vsel %vm1727_vm2, %v313_v35, 0 }
  0x37   : > { %573 = vrot.lane.b32.xlu1 %v460_v36, %s1685_s23 }
  0x3a   : > { %588 = vrot.lane.b32.xlu0 %v428_v8, %s1686_s24  ;;  %v268_v8 = vshll.u32 %v1847_v22, 16 }
  0x3b   : > { %577 = vrot.lane.b32.xlu1 %v1896_v23, %s1685_s23 }
  0x3c   : > { %v1935_v12 = vor.u32 %v268_v8, %v267_v1 }
  0x3e   : > { %592 = vrot.lane.b32.xlu0 %v430_v15, %s1686_s24  ;;  %v281_v15 = vrot.slane %v279_v14, 7 }
  0x3f   : > { %590 = vrot.lane.b32.xlu1 %v1832_v6, %s1686_s24  ;;  %v274_v6 = vrot.slane %v272_v7, 7  ;;  %v445_v7 = vrot.slane %v402_v52, 1 }
  0x42   : > { %604 = vrot.lane.b32.xlu0 %v1778_v34, %s1687_s27  ;;  %v1939_v34 = vor.u32 %v275_v13, %v274_v6  ;;  %v446_v6 = vor.u32 %v445_v7, %v399_v26 }
  0x43   : > { %594 = vrot.lane.b32.xlu1 %v1925_v5, %s1686_s24 }
  0x44   : > { %v464_v11 = vsel %vm1727_vm2, %v446_v6, 0 }
  0x46   : > { %608 = vrot.lane.b32.xlu0 %v1824_v63, %s1687_s27  ;;  %v1949_v63 = vor.u32 %v282_v17, %v281_v15 }
  0x47   : > { %606 = vrot.lane.b32.xlu1 %v1794_v45, %s1687_s27  ;;  %v196_v45 = vld [vmem:[%s1742_s20 + $0x5c] sm:$0xf] }
  0x48   : > { %v220_v33 = vmax.bf16 %v204_v24, %v196_v45 }
  0x4a   : > { %621 = vrot.lane.b32.xlu0 %v460_v36, %s1688_s5  ;;  %v314_v36 = vrot.slane %v268_v8, 1  ;;  %v228_v41 = vmax.bf16 %v220_v33, %v212_v30 }
  0x4b   : > { %610 = vrot.lane.b32.xlu1 %v1863_v38, %s1687_s27 }
  0x4c   : > { %v1548_v32 = vcombine.low %v228_v41, %v228_v41 }
  0x4e   : > { %491 = vrot.lane.b32.xlu0 %v1815_v58, %s1681_s14  ;;  %v315_v58 = vor.u32 %v314_v36, %v265_v57  ;;  %v413_v53 = vshrl.u32 %v1548_v32, 16 }
  0x4f   : > { %623 = vrot.lane.b32.xlu1 %v1874_v31, %s1688_s5  ;;  %v463_v31 = vsel %vm1727_vm2, %v444_v29, 0 }
  0x50   : > { %v336_v47 = vsel %vm1727_vm2, %v315_v58, 0  ;;  %v415_v57 = vrot.slane %v413_v53, 7 }
  0x52   : > { %625 = vrot.lane.b32.xlu0 %v1896_v23, %s1688_s5  ;;  %v318_v23 = vrot.slane %v282_v17, 1  ;;  %v474_v17 = vshll.u32 %v2013_v9, 16 }
  0x53   : > { %493 = vrot.lane.b32.xlu1 %v1847_v22, %s1681_s14  ;;  %v409_v22 = vshll.u32 %v1967_v40, 16 }
  0x54   : > { %v319_v49 = vor.u32 %v318_v23, %v279_v14  ;;  %v471_v14 = vshrl.u32 %v2013_v9, 16  ;;  %v479_v24 = vrot.slane %v474_v17, 1 }
  0x55   : > { %v411_v54 = vor.u32 %v409_v22, %v408_v48 }
  0x56   : > { %495 = vrot.lane.b32.xlu0 %v226_v59, %s1681_s14  ;;  %v338_v55 = vsel %vm1727_vm2, %v319_v49, 0  ;;  %v416_v59 = vshll.u32 %v1548_v32, 16  ;;  %v473_v16 = vrot.slane %v471_v14, 7  ;;  %v480_v30 = vor.u32 %v479_v24, %v471_v14 }
  0x57   : > { %627 = vrot.lane.b32.xlu1 %v463_v31, %s1688_s5  ;;  %v433_v61 = vsel %vm1804_vm5, 0, %v411_v54  ;;  %v297_v54 = vsel %vm1804_vm5, 0, %v1881_v42 }
  0x58   : > { %v418_v1 = vor.u32 %v416_v59, %v415_v57  ;;  %v476_v18 = vor.u32 %v474_v17, %v473_v16  ;;  %v2052_v27 = vsel %vm1727_vm2, %v480_v30, 0 }
  0x5a   : > { %515 = vrot.lane.b32.xlu0 %v335_v43, %s1682_s16  ;;  %v434_v4 = vsel %vm1804_vm5, 0, %v418_v1  ;;  %v478_v21 = vsel %vm1804_vm5, 0, %v476_v18 }
  0x5b   : > { %497 = vrot.lane.b32.xlu1 %v227_v10, %s1681_s14  ;;  %v449_v10 = vrot.slane %v416_v59, 1 }
  0x5d   : > { %v450_v13 = vor.u32 %v449_v10, %v413_v53  ;;  %v2064_v53 = vsel %vm1804_vm5, 0, %v232_v50  ;;  %v298_v10 = vsel %vm1804_vm5, 0, %v1868_v39 }
  0x5e   : > { %519 = vrot.lane.b32.xlu0 %v337_v37, %s1682_s16 }
  0x5f   : > { %517 = vrot.lane.b32.xlu1 %v336_v47, %s1682_s16  ;;  %v466_v15 = vsel %vm1727_vm2, %v450_v13, 0 }
  0x62   : > { %539 = vrot.lane.b32.xlu0 %v1925_v5, %s1683_s21  ;;  %v447_v5 = vrot.slane %v409_v22, 1 }
  0x63   : > { %521 = vrot.lane.b32.xlu1 %v338_v55, %s1682_s16 }
  0x64   : > { %v448_v8 = vor.u32 %v447_v5, %v406_v46 }
  0x66   : > { %543 = vrot.lane.b32.xlu0 %v433_v61, %s1683_s21 }
  0x67   : > { %541 = vrot.lane.b32.xlu1 %v432_v62, %s1683_s21 }
  0x6a   : > { %555 = vrot.lane.b32.xlu0 %v1863_v38, %s1684_s22  ;;  %v465_v38 = vsel %vm1727_vm2, %v448_v8, 0 }
  0x6b   : > { %545 = vrot.lane.b32.xlu1 %v434_v4, %s1683_s21 }
  0x6e   : > { %559 = vrot.lane.b32.xlu0 %v1967_v40, %s1684_s22 }
  0x6f   : > { %557 = vrot.lane.b32.xlu1 %v1971_v28, %s1684_s22 }
  0x72   : > { %579 = vrot.lane.b32.xlu0 %v463_v31, %s1685_s23 }
  0x73   : > { %561 = vrot.lane.b32.xlu1 %v1548_v32, %s1684_s22 }
  0x76   : > { %583 = vrot.lane.b32.xlu0 %v465_v38, %s1685_s23 }
  0x77   : > { %581 = vrot.lane.b32.xlu1 %v464_v11, %s1685_s23 }
  0x7a   : > { %596 = vrot.lane.b32.xlu0 %v432_v62, %s1686_s24 }
  0x7b   : > { %585 = vrot.lane.b32.xlu1 %v466_v15, %s1685_s23 }
  0x7e   : > { %600 = vrot.lane.b32.xlu0 %v434_v4, %s1686_s24  ;;  %v484_v19 = vpop.permute.xlu0 %483 }
  0x7f   : > { %598 = vrot.lane.b32.xlu1 %v433_v61, %s1686_s24  ;;  %v640_v56 = vsel %vm637_vm7, %v2064_v53, %v484_v19 }
  0x82   : > { %612 = vrot.lane.b32.xlu0 %v1971_v28, %s1687_s27  ;;  %v508_v45 = vpop.permute.xlu0 %507 }
  0x83   : > { %602 = vrot.lane.b32.xlu1 %v478_v21, %s1686_s24 }
  0x86   : > { %616 = vrot.lane.b32.xlu0 %v1548_v32, %s1687_s27 }
  0x87   : > { %614 = vrot.lane.b32.xlu1 %v1967_v40, %s1687_s27 }
  0x89   : > { %v2039_v25 = vpop.permute.xlu1 %487  ;;  %v486_v29 = vpop.permute.xlu0 %485 }
  0x8a   : > { %629 = vrot.lane.b32.xlu0 %v464_v11, %s1688_s5  ;;  %v643_v57 = vsel %vm637_vm7, %v297_v54, %v486_v29  ;;  %v646_v39 = vsel %vm637_vm7, %v298_v10, %v2039_v25  ;;  %v301_v10 = vsel %vm1804_vm5, 0, %v1935_v12 }
  0x8b   : > { %618 = vrot.lane.b32.xlu1 %v2013_v9, %s1687_s27 }
  0x8d   : > { %v2044_v33 = vpop.permute.xlu1 %489 }
  0x8e   : > { %633 = vrot.lane.b32.xlu0 %v466_v15, %s1688_s5 }
  0x8f   : > { %631 = vrot.lane.b32.xlu1 %v465_v38, %s1688_s5  ;;  %v299_v38 = vsel %vm1804_vm5, 0, %v1885_v20 }
  0x90   : > { %v2048_v35 = vpop.permute.xlu0 %511  ;;  %v649_v20 = vsel %vm637_vm7, %v299_v38, %v2044_v33 }
  0x91   : > { %v510_v36 = vpop.permute.xlu1 %509 }
  0x92   : > { %1039 = vrot.lane.b32.xlu0 %v1680_v0, %s1682_s16  ;;  %v664_v0 = vsel %vm662_vm8, %v640_v56, %v508_v45  ;;  %v666_v61 = vsel %vm662_vm8, %v643_v57, %v510_v36  ;;  %v668_v45 = vsel %vm662_vm8, %v646_v39, %v2048_v35 }
  0x93   : > { %635 = vrot.lane.b32.xlu1 %v2052_v27, %s1688_s5 }
  0x94   : > { %v532_v40 = vpop.permute.xlu0 %531 }
  0x95   : > { %v514_v31 = vpop.permute.xlu1 %513  ;;  %v681_v1 = vsel %vm679_vm9, %v664_v0, %v532_v40 }
  0x96   : > { %1062 = vrot.lane.b32.xlu0 %v1734_v3, %s1684_s22  ;;  %v670_v24 = vsel %vm662_vm8, %v649_v20, %v514_v31 }
  0x97   : > { %1149 = vrot.lane.b32.xlu1 %v478_v21, %s1689_s6 }
  0x98   : > { %v536_v28 = vpop.permute.xlu0 %535 }
  0x99   : > { %v534_v41 = vpop.permute.xlu1 %533  ;;  %v685_v30 = vsel %vm679_vm9, %v668_v45, %v536_v28 }
  0x9a   : > { %v683_v42 = vsel %vm679_vm9, %v666_v61, %v534_v41 }
  0x9b   : > { %1165 = vrot.lane.b32.xlu1 %v2013_v9, %s1690_s7 }
  0x9c   : > { %v548_v43 = vpop.permute.xlu0 %547 }
  0x9d   : > { %v538_v44 = vpop.permute.xlu1 %537  ;;  %v698_v5 = vsel %vm696_vm10, %v681_v1, %v548_v43 }
  0x9e   : > { %v687_v36 = vsel %vm679_vm9, %v670_v24, %v538_v44 }
  0xa0   : > { %v552_v58 = vpop.permute.xlu0 %551 }
  0xa1   : > { %v550_v46 = vpop.permute.xlu1 %549  ;;  %v702_v41 = vsel %vm696_vm10, %v685_v30, %v552_v58 }
  0xa2   : > { %v700_v7 = vsel %vm696_vm10, %v683_v42, %v550_v46 }
  0xa4   : > { %v572_v23 = vpop.permute.xlu0 %571 }
  0xa5   : > { %v554_v26 = vpop.permute.xlu1 %553  ;;  %v715_v8 = vsel %vm713_vm11, %v698_v5, %v572_v23 }
  0xa6   : > { %v704_v25 = vsel %vm696_vm10, %v687_v36, %v554_v26 }
  0xa8   : > { %v576_v32 = vpop.permute.xlu0 %575 }
  0xa9   : > { %v574_v37 = vpop.permute.xlu1 %573  ;;  %v719_v33 = vsel %vm713_vm11, %v702_v41, %v576_v32 }
  0xaa   : > { %v717_v6 = vsel %vm713_vm11, %v700_v7, %v574_v37 }
  0xac   : > { %v589_v47 = vpop.permute.xlu0 %588 }
  0xad   : > { %v578_v48 = vpop.permute.xlu1 %577  ;;  %v732_v11 = vsel %vm730_vm12, %v715_v8, %v589_v47 }
  0xae   : > { %v721_v43 = vsel %vm713_vm11, %v704_v25, %v578_v48 }
  0xb0   : > { %v593_v22 = vpop.permute.xlu0 %592 }
  0xb1   : > { %v591_v49 = vpop.permute.xlu1 %590  ;;  %v736_v35 = vsel %vm730_vm12, %v719_v33, %v593_v22 }
  0xb2   : > { %v734_v13 = vsel %vm730_vm12, %v717_v6, %v591_v49  ;;  %v300_v6 = vsel %vm1804_vm5, 0, %v1914_v60  ;;  %v303_v60 = vsel %vm1804_vm5, 0, %v1949_v63 }
  0xb4   : > { %v605_v3 = vpop.permute.xlu0 %604 }
  0xb5   : > { %v595_v52 = vpop.permute.xlu1 %594  ;;  %v749_v15 = vsel %vm747_vm13, %v732_v11, %v605_v3 }
  0xb6   : > { %v738_v31 = vsel %vm730_vm12, %v721_v43, %v595_v52 }
  0xb8   : > { %v609_v55 = vpop.permute.xlu0 %608 }
  0xb9   : > { %v607_v59 = vpop.permute.xlu1 %606  ;;  %v753_v28 = vsel %vm747_vm13, %v736_v35, %v609_v55 }
  0xba   : > { %v751_v16 = vsel %vm747_vm13, %v734_v13, %v607_v59 }
  0xbc   : > { %v622_v62 = vpop.permute.xlu0 %621 }
  0xbd   : > { %v611_v4 = vpop.permute.xlu1 %610  ;;  %v766_v18 = vsel %vm764_vm14, %v749_v15, %v622_v62 }
  0xbe   : > { %v755_v44 = vsel %vm747_vm13, %v738_v31, %v611_v4 }
  0xc0   : > { %v492_v14 = vpop.permute.xlu0 %491 }
  0xc1   : > { %v624_v17 = vpop.permute.xlu1 %623  ;;  %v652_v13 = vsel %vm637_vm7, %v300_v6, %v492_v14 }
  0xc2   : > { %v768_v19 = vsel %vm764_vm14, %v751_v16, %v624_v17  ;;  %v302_v16 = vsel %vm1804_vm5, 0, %v1939_v34 }
  0xc3   : > { %v1550_v21 = vcombine.low %v766_v18, %v768_v19 }
  0xc4   : > { %v626_v29 = vpop.permute.xlu0 %625 }
  0xc5   : > { %v494_v40 = vpop.permute.xlu1 %493  ;;  %1615 = vmatprep.mubr.msk.bf16.mxu0 %vm821_vm15, %v1550_v21  ;;  %v770_v37 = vsel %vm764_vm14, %v753_v28, %v626_v29 }
  0xc6   : > { %v655_v15 = vsel %vm637_vm7, %v301_v10, %v494_v40 }
  0xc8   : > { %v496_v46 = vpop.permute.xlu0 %495 }
  0xc9   : > { %v628_v23 = vpop.permute.xlu1 %627  ;;  %v658_v34 = vsel %vm637_vm7, %v302_v16, %v496_v46 }
  0xca   : > { %v772_v58 = vsel %vm764_vm14, %v755_v44, %v628_v23 }
  0xcb   : > { %v1551_v47 = vcombine.low %v770_v37, %v772_v58 }
  0xcc   : > { %v516_v26 = vpop.permute.xlu0 %515 }
  0xcd   : > { %v498_v49 = vpop.permute.xlu1 %497  ;;  %1616 = vmatmul.mubr.msk.bf16.vlgmr.msra.gmra.mxu0 %vm821_vm15, %v1551_v47  ;;  %v672_v17 = vsel %vm662_vm8, %v652_v13, %v516_v26 }
  0xce   : > { %v661_v45 = vsel %vm637_vm7, %v303_v60, %v498_v49 }
  0xd0   : > { %v520_v32 = vpop.permute.xlu0 %519 }
  0xd1   : > { %v518_v48 = vpop.permute.xlu1 %517  ;;  %v676_v29 = vsel %vm662_vm8, %v658_v34, %v520_v32 }
  0xd2   : > { %v674_v18 = vsel %vm662_vm8, %v655_v15, %v518_v48 }
  0xd4   : > { %v540_v22 = vpop.permute.xlu0 %539 }
  0xd5   : > { %v522_v50 = vpop.permute.xlu1 %521  ;;  %v689_v12 = vsel %vm679_vm9, %v672_v17, %v540_v22 }
  0xd6   : > { %v678_v30 = vsel %vm662_vm8, %v661_v45, %v522_v50 }
  0xd8   : > { %v544_v3 = vpop.permute.xlu0 %543 }
  0xd9   : > { %v542_v52 = vpop.permute.xlu1 %541  ;;  %v693_v41 = vsel %vm679_vm9, %v676_v29, %v544_v3 }
  0xda   : > { %v691_v19 = vsel %vm679_vm9, %v674_v18, %v542_v52 }
  0xdc   : > { %v556_v54 = vpop.permute.xlu0 %555 }
  0xdd   : > { %v546_v55 = vpop.permute.xlu1 %545  ;;  %v706_v20 = vsel %vm696_vm10, %v689_v12, %v556_v54 }
  0xde   : > { %v695_v25 = vsel %vm679_vm9, %v678_v30, %v546_v55 }
  0xe0   : > { %v560_v56 = vpop.permute.xlu0 %559 }
  0xe1   : > { %v558_v57 = vpop.permute.xlu1 %557  ;;  %v710_v31 = vsel %vm696_vm10, %v693_v41, %v560_v56 }
  0xe2   : > { %v708_v21 = vsel %vm696_vm10, %v691_v19, %v558_v57 }
  0xe4   : > { %v580_v59 = vpop.permute.xlu0 %579 }
  0xe5   : > { %v562_v0 = vpop.permute.xlu1 %561  ;;  %v723_v24 = vsel %vm713_vm11, %v706_v20, %v580_v59 }
  0xe6   : > { %v712_v46 = vsel %vm696_vm10, %v695_v25, %v562_v0 }
  0xe8   : > { %v584_v61 = vpop.permute.xlu0 %583 }
  0xe9   : > { %v582_v62 = vpop.permute.xlu1 %581  ;;  %v727_v23 = vsel %vm713_vm11, %v710_v31, %v584_v61 }
  0xea   : > { %v725_v63 = vsel %vm713_vm11, %v708_v21, %v582_v62 }
  0xec   : > { %v597_v1 = vpop.permute.xlu0 %596 }
  0xed   : > { %v586_v42 = vpop.permute.xlu1 %585  ;;  %v740_v36 = vsel %vm730_vm12, %v723_v24, %v597_v1 }
  0xee   : > { %v729_v37 = vsel %vm713_vm11, %v712_v46, %v586_v42 }
  0xf0   : > { %v601_v4 = vpop.permute.xlu0 %600 }
  0xf1   : > { %v599_v5 = vpop.permute.xlu1 %598  ;;  %v744_v26 = vsel %vm730_vm12, %v727_v23, %v601_v4 }
  0xf2   : > { %v742_v40 = vsel %vm730_vm12, %v725_v63, %v599_v5 }
  0xf4   : > { %v613_v7 = vpop.permute.xlu0 %612 }
  0xf5   : > { %v603_v8 = vpop.permute.xlu1 %602  ;;  %v757_v33 = vsel %vm747_vm13, %v740_v36, %v613_v7 }
  0xf6   : > { %v746_v49 = vsel %vm730_vm12, %v729_v37, %v603_v8 }
  0xf8   : > { %v617_v38 = vpop.permute.xlu0 %616 }
  0xf9   : > { %v615_v11 = vpop.permute.xlu1 %614  ;;  %v761_v32 = vsel %vm747_vm13, %v744_v26, %v617_v38 }
  0xfa   : > { %v759_v43 = vsel %vm747_vm13, %v742_v40, %v615_v11 }
  0xfc   : > { %v630_v39 = vpop.permute.xlu0 %629 }
  0xfd   : > { %v619_v14 = vpop.permute.xlu1 %618  ;;  %v774_v28 = vsel %vm764_vm14, %v757_v33, %v630_v39 }
  0xfe   : > { %v763_v48 = vsel %vm747_vm13, %v746_v49, %v619_v14 }
 0x100   : > { %v634_v58 = vpop.permute.xlu0 %633 }
 0x101   : > { %v632_v35 = vpop.permute.xlu1 %631  ;;  %v778_v50 = vsel %vm764_vm14, %v761_v32, %v634_v58 }
 0x102   : > { %v776_v44 = vsel %vm764_vm14, %v759_v43, %v632_v35 }
 0x103   : > { %v1552_v47 = vcombine.low %v774_v28, %v776_v44 }
 0x105   : > { %v636_v22 = vpop.permute.xlu1 %635  ;;  %1619 = vmatprep.mubr.msk.bf16.mxu0 %vm821_vm15, %v1552_v47  ;;  %v1667_v47 = vld [vmem:[%s2461_s2 + $0x20] ss:$0 sps:$4 sm:$0xff]  }
 0x106   : > { %v780_v3 = vsel %vm764_vm14, %v763_v48, %v636_v22  ;;  %1642 = vmatprep.subr.msk.bf16.mxu1 %vm328_vm0, %v1667_v47  ;;  %v1393_v22 = vsel %vm328_vm0, %v1667_v47, 0  ;;  %vm1254_vm0 = vcmask 326656  }
 0x107   : > { %v1553_v52 = vcombine.low %v778_v50, %v780_v3  ;;  %v1668_v50 = vld [vmem:[%s2461_s2 + $0x18] sm:$0xff]   ;;  %1624 = vmatpush3.bf16.msra.mxu1 %v1393_v22 }
 0x108   : > { %1625 = vmatprep.subr.bf16.mxu1 %v1668_v50 }
 0x109   : > { %1620 = vmatmul.mubr.msk.bf16.gmra.mxu0 %vm821_vm15, %v1553_v52  ;;  %v1669_v52 = vld [vmem:[%s2461_s2 + $0x10] sm:$0xff]  }
 0x10b   : > { %1626 = vmatpush3.bf16.msra.mxu1 %v1668_v50 }
 0x10c   : > { %1627 = vmatprep.subr.bf16.mxu1 %v1669_v52 }
 0x10f   : > { %1628 = vmatpush3.bf16.msra.mxu1 %v1669_v52 }
 0x18d   : > { %v1617_v54 = vpop.f32.mrf.mxu0 }
 0x18e   : > { %v905_v55 = vmax.f32 %v1617_v54, 0.0 }
 0x18f   : > { %v872_v56 = vpop.f32.mrf.mxu0 }
 0x190   : > { %v1587_v57 = vpack.c.bf16 %v905_v55, %v905_v55  ;;  %v903_v59 = vmax.f32 %v872_v56, 0.0 }
 0x191   : > { %v1618_v0 = vpop.f32.mrf.mxu0 }
 0x192   : > { %1106 = vrot.lane.b32.xlu0 %v1587_v57, %s1688_s5  ;;  %1045 = vrot.lane.b32.xlu1 %v1587_v57, %s1682_s16  ;;  %v1585_v61 = vpack.c.bf16 %v903_v59, %v903_v59  ;;  %v906_v62 = vmax.f32 %v1618_v0, 0.0  ;;  %v952_v4 = vshll.u32 %v1587_v57, 16  ;;  %v949_v5 = vshrl.u32 %v1587_v57, 16 }
 0x193   : > { %v875_v42 = vpop.f32.mrf.mxu0 }
 0x194   : > { %v1588_v1 = vpack.c.bf16 %v906_v62, %v906_v62  ;;  %v904_v9 = vmax.f32 %v875_v42, 0.0  ;;  %v1001_v7 = vrot.slane %v952_v4, 1  ;;  %v951_v10 = vrot.slane %v949_v5, 7  ;;  %v2265_v62 = vpop.permute.xlu1 %1149 }
 0x195   : > { %v935_v15 = vshrl.u32 %v1585_v61, 16  ;;  %v938_v60 = vshll.u32 %v1585_v61, 16 }
 0x196   : > { %1153 = vrot.lane.b32.xlu1 %v1587_v57, %s1690_s7  ;;  %1102 = vrot.lane.b32.xlu0 %v1585_v61, %s1688_s5  ;;  %v1586_v8 = vpack.c.bf16 %v904_v9, %v904_v9  ;;  %v1002_v6 = vor.u32 %v1001_v7, %v949_v5  ;;  %v954_v11 = vor.u32 %v952_v4, %v951_v10  ;;  %v956_v34 = vshrl.u32 %v1588_v1, 16  ;;  %v1670_v57 = vld [vmem:[%s2461_s2 + $0x8] sm:$0xff]   ;;  %v1671_v9 = vld [vmem:[%s2461_s2] sm:$0xff]  }
 0x197   : > { %v937_v17 = vrot.slane %v935_v15, 7  ;;  %v997_v39 = vrot.slane %v938_v60, 1  ;;  %v959_v29 = vshll.u32 %v1588_v1, 16  ;;  %1629 = vmatprep.subr.bf16.mxu1 %v1670_v57 }
 0x198   : > { %v1020_v38 = vsel %vm1727_vm2, %v1002_v6, 0  ;;  %v2177_v13 = vsel %vm1804_vm5, 0, %v954_v11  ;;  %v958_v63 = vrot.slane %v956_v34, 7  ;;  %v942_v35 = vshrl.u32 %v1586_v8, 16  ;;  %1630 = vmatpush3.bf16.msra.mxu1 %v1670_v57  ;;  %v2287_v10 = vpop.permute.xlu1 %1165 }
 0x199   : > { %v940_v19 = vor.u32 %v938_v60, %v937_v17  ;;  %v998_v21 = vor.u32 %v997_v39, %v935_v15  ;;  %v1003_v40 = vrot.slane %v959_v29, 1  ;;  %v945_v31 = vshll.u32 %v1586_v8, 16  ;;  %1631 = vmatprep.subr.bf16.mxu1 %v1671_v9 }
 0x19a   : > { %1041 = vrot.lane.b32.xlu1 %v1585_v61, %s1682_s16  ;;  %1155 = vrot.lane.b32.xlu0 %v1588_v1, %s1690_s7  ;;  %v961_v36 = vor.u32 %v959_v29, %v958_v63  ;;  %v944_v44 = vrot.slane %v942_v35, 7  ;;  %v2263_v61 = vpop.permute.xlu0 %1039 }
 0x19b   : > { %v2193_v20 = vsel %vm1804_vm5, 0, %v940_v19  ;;  %v1018_v24 = vsel %vm1727_vm2, %v998_v21, 0  ;;  %v1004_v25 = vor.u32 %v1003_v40, %v956_v34  ;;  %v999_v28 = vrot.slane %v945_v31, 1 }
 0x19c   : > { %v2211_v41 = vsel %vm1804_vm5, 0, %v961_v36  ;;  %v947_v58 = vor.u32 %v945_v31, %v944_v44  ;;  %1632 = vmatpush3.bf16.msra.mxu1 %v1671_v9  ;;  %v1184_v52 = vsel %vm662_vm8, %v2064_v53, %v2263_v61 }
 0x19d   : > { %v1021_v43 = vsel %vm1727_vm2, %v1004_v25, 0  ;;  %v1000_v37 = vor.u32 %v999_v28, %v942_v35 }
 0x19e   : > { %1047 = vrot.lane.b32.xlu0 %v1588_v1, %s1682_s16  ;;  %1108 = vrot.lane.b32.xlu1 %v1588_v1, %s1688_s5  ;;  %v2238_v32 = vsel %vm1804_vm5, 0, %v947_v58  ;;  %v2285_v6 = vpop.permute.xlu0 %1062 }
 0x19f   : > { %v1019_v49 = vsel %vm1727_vm2, %v1000_v37, 0 }
 0x1a2   : > { %1104 = vrot.lane.b32.xlu1 %v1586_v8, %s1688_s5  ;;  %1043 = vrot.lane.b32.xlu0 %v1586_v8, %s1682_s16 }
 0x1a6   : > { %1068 = vrot.lane.b32.xlu1 %v1020_v38, %s1684_s22  ;;  %1151 = vrot.lane.b32.xlu0 %v1586_v8, %s1690_s7 }
 0x1aa   : > { %1137 = vrot.lane.b32.xlu1 %v2177_v13, %s1689_s6  ;;  %1090 = vrot.lane.b32.xlu0 %v2177_v13, %s1686_s24 }
 0x1ae   : > { %1169 = vrot.lane.b32.xlu1 %v1020_v38, %s1691_s8  ;;  %1123 = vrot.lane.b32.xlu0 %v1020_v38, %s1692_s9 }
 0x1c9   : > { %v1621_v16 = vpop.f32.mrf.mxu0 }
 0x1ca   : > { %v909_v18 = vmax.f32 %v1621_v16, 0.0 }
 0x1cb   : > { %v888_v14 = vpop.f32.mrf.mxu0 }
 0x1cc   : > { %v2185_v12 = vpack.c.bf16 %v909_v18, %v909_v18  ;;  %v907_v45 = vmax.f32 %v888_v14, 0.0 }
 0x1cd   : > { %v1622_v33 = vpop.f32.mrf.mxu0 }
 0x1ce   : > { %1114 = vrot.lane.b32.xlu0 %v2185_v12, %s1688_s5  ;;  %1053 = vrot.lane.b32.xlu1 %v2185_v12, %s1682_s16  ;;  %v2203_v30 = vpack.c.bf16 %v907_v45, %v907_v45  ;;  %v910_v46 = vmax.f32 %v1622_v33, 0.0  ;;  %v980_v48 = vshll.u32 %v2185_v12, 16  ;;  %v977_v54 = vshrl.u32 %v2185_v12, 16 }
 0x1cf   : > { %v891_v26 = vpop.f32.mrf.mxu0 }
 0x1d0   : > { %v2224_v23 = vpack.c.bf16 %v910_v46, %v910_v46  ;;  %v908_v3 = vmax.f32 %v891_v26, 0.0  ;;  %v1009_v55 = vrot.slane %v980_v48, 1  ;;  %v979_v0 = vrot.slane %v977_v54, 7 }
 0x1d1   : > { %v963_v4 = vshrl.u32 %v2203_v30, 16  ;;  %v966_v8 = vshll.u32 %v2203_v30, 16 }
 0x1d2   : > { %1086 = vrot.lane.b32.xlu0 %v2193_v20, %s1686_s24  ;;  %1161 = vrot.lane.b32.xlu1 %v2185_v12, %s1690_s7  ;;  %v2255_v56 = vpack.c.bf16 %v908_v3, %v908_v3  ;;  %v1010_v59 = vor.u32 %v1009_v55, %v977_v54  ;;  %v982_v42 = vor.u32 %v980_v48, %v979_v0  ;;  %v1027_v17 = vshrl.u32 %v2224_v23, 16 }
 0x1d3   : > { %v965_v7 = vrot.slane %v963_v4, 7  ;;  %v1005_v11 = vrot.slane %v966_v8, 1  ;;  %v1030_v21 = vshll.u32 %v2224_v23, 16  ;;  %v1207_v54 = vsel %vm696_vm10, %v1184_v52, %v2285_v6 }
 0x1d4   : > { %v1024_v1 = vsel %vm1727_vm2, %v1010_v59, 0  ;;  %v2278_v5 = vsel %vm1804_vm5, 0, %v982_v42  ;;  %v1029_v14 = vrot.slane %v1027_v17, 7  ;;  %v973_v34 = vshll.u32 %v2255_v56, 16 }
 0x1d5   : > { %v968_v38 = vor.u32 %v966_v8, %v965_v7  ;;  %v1006_v18 = vor.u32 %v1005_v11, %v963_v4  ;;  %v970_v63 = vshrl.u32 %v2255_v56, 16 }
 0x1d6   : > { %1119 = vrot.lane.b32.xlu0 %v1018_v24, %s1692_s9  ;;  %1064 = vrot.lane.b32.xlu1 %v1018_v24, %s1684_s22  ;;  %v1032_v29 = vor.u32 %v1030_v21, %v1029_v14  ;;  %v1007_v36 = vrot.slane %v973_v34, 1 }
 0x1d7   : > { %v2297_v60 = vsel %vm1804_vm5, 0, %v968_v38  ;;  %v1022_v39 = vsel %vm1727_vm2, %v1006_v18, 0  ;;  %v972_v33 = vrot.slane %v970_v63, 7 }
 0x1d8   : > { %v1034_v35 = vsel %vm1804_vm5, 0, %v1032_v29  ;;  %v1008_v46 = vor.u32 %v1007_v36, %v970_v63 }
 0x1d9   : > { %v975_v58 = vor.u32 %v973_v34, %v972_v33 }
 0x1da   : > { %1110 = vrot.lane.b32.xlu0 %v2203_v30, %s1688_s5  ;;  %1157 = vrot.lane.b32.xlu1 %v2203_v30, %s1690_s7 }
 0x1de   : > { %1139 = vrot.lane.b32.xlu0 %v2211_v41, %s1689_s6  ;;  %1049 = vrot.lane.b32.xlu1 %v2203_v30, %s1682_s16  ;;  %v1035_v30 = vrot.slane %v1030_v21, 1 }
 0x1e0   : > { %v1036_v31 = vor.u32 %v1035_v30, %v1027_v17 }
 0x1e2   : > { %1171 = vrot.lane.b32.xlu0 %v1021_v43, %s1691_s8  ;;  %1092 = vrot.lane.b32.xlu1 %v2211_v41, %s1686_s24  ;;  %v1038_v37 = vsel %vm1727_vm2, %v1036_v31, 0 }
 0x1e6   : > { %1070 = vrot.lane.b32.xlu0 %v1021_v43, %s1684_s22  ;;  %1125 = vrot.lane.b32.xlu1 %v1021_v43, %s1692_s9 }
 0x1ea   : > { %1163 = vrot.lane.b32.xlu0 %v2224_v23, %s1690_s7  ;;  %1116 = vrot.lane.b32.xlu1 %v2224_v23, %s1688_s5 }
 0x1ee   : > { %1066 = vrot.lane.b32.xlu0 %v1019_v49, %s1684_s22  ;;  %1088 = vrot.lane.b32.xlu1 %v2238_v32, %s1686_s24 }
 0x1f2   : > { %1135 = vrot.lane.b32.xlu0 %v2238_v32, %s1689_s6  ;;  %1121 = vrot.lane.b32.xlu1 %v1019_v49, %s1692_s9 }
 0x1f6   : > { %1167 = vrot.lane.b32.xlu0 %v1019_v49, %s1691_s8  ;;  %1112 = vrot.lane.b32.xlu1 %v2255_v56, %s1688_s5 }
 0x1fa   : > { %1076 = vrot.lane.b32.xlu1 %v1024_v1, %s1684_s22  ;;  %1051 = vrot.lane.b32.xlu0 %v2255_v56, %s1682_s16  ;;  %s1539_s16 = sshll.u32 %s1719_s13, 3 }
 0x1fb   : > { %p167_p4 = scmp.lt.s32.totalorder %s1539_s16, 15 }
 0x1fd   : > { %s2468_s16 = smov (!%p167_p4, %s1539_s16), 15 }
 0x1fe   : > { %1145 = vrot.lane.b32.xlu1 %v2278_v5, %s1689_s6  ;;  %1159 = vrot.lane.b32.xlu0 %v2255_v56, %s1690_s7 }
 0x202   : > { %1177 = vrot.lane.b32.xlu1 %v1024_v1, %s1691_s8  ;;  %1098 = vrot.lane.b32.xlu0 %v2278_v5, %s1686_s24 }
 0x204   : > { %v2292_v15 = vpop.permute.xlu0 %1106  ;;  %v1046_v16 = vpop.permute.xlu1 %1045 }
 0x205   : > { %v1193_v47 = vsel %vm662_vm8, %v2177_v13, %v1046_v16 }
 0x206   : > { %1141 = vrot.lane.b32.xlu1 %v2297_v60, %s1689_s6  ;;  %1131 = vrot.lane.b32.xlu0 %v1024_v1, %s1692_s9 }
 0x208   : > { %v2302_v12 = vpop.permute.xlu1 %1153  ;;  %v1103_v19 = vpop.permute.xlu0 %1102 }
 0x20a   : > { %1173 = vrot.lane.b32.xlu1 %v1022_v39, %s1691_s8  ;;  %1094 = vrot.lane.b32.xlu0 %v2297_v60, %s1686_s24 }
 0x20c   : > { %v1042_v45 = vpop.permute.xlu1 %1041  ;;  %v2311_v24 = vpop.permute.xlu0 %1155 }
 0x20d   : > { %v1187_v11 = vsel %vm662_vm8, %v2193_v20, %v1042_v45 }
 0x20e   : > { %1072 = vrot.lane.b32.xlu1 %v1022_v39, %s1684_s22  ;;  %1127 = vrot.lane.b32.xlu0 %v1022_v39, %s1692_s9 }
 0x210   : > { %v1048_v40 = vpop.permute.xlu0 %1047  ;;  %v2316_v25 = vpop.permute.xlu1 %1108 }
 0x211   : > { %v2320_v43 = vsel %vm662_vm8, %v2211_v41, %v1048_v40  ;;  %v1023_v41 = vsel %vm1727_vm2, %v1008_v46, 0  ;;  %vm1288_vm2 = vcmask 457728  }
 0x212   : > { %1100 = vrot.lane.b32.xlu1 %v1034_v35, %s1686_s24  ;;  %1147 = vrot.lane.b32.xlu0 %v1034_v35, %s1689_s6 }
 0x214   : > { %v1105_v28 = vpop.permute.xlu1 %1104  ;;  %v1044_v44 = vpop.permute.xlu0 %1043 }
 0x215   : > { %v2328_v23 = vsel %vm662_vm8, %v2238_v32, %v1044_v44  ;;  %v2343_v32 = vsel %vm1804_vm5, 0, %v975_v58 }
 0x216   : > { %1133 = vrot.lane.b32.xlu1 %v1038_v37, %s1692_s9  ;;  %1074 = vrot.lane.b32.xlu0 %v1023_v41, %s1684_s22  ;;  %s1540_s22 = sshll.u32 %s2468_s16, 3 }
 0x217   : > { %s170_s26 = scalar_lea.vmem %s2462_s3, %s1540_s22 }
 0x218   : > { %v1069_v26 = vpop.permute.xlu1 %1068  ;;  %v1152_v2 = vpop.permute.xlu0 %1151 }
 0x219   : > { %v2339_v49 = vsel %vm696_vm10, %v1193_v47, %v1069_v26 }
 0x21a   : > { %1143 = vrot.lane.b32.xlu0 %v2343_v32, %s1689_s6  ;;  %1096 = vrot.lane.b32.xlu1 %v2343_v32, %s1686_s24 }
 0x21c   : > { %v1138_v13 = vpop.permute.xlu1 %1137  ;;  %v1091_v51 = vpop.permute.xlu0 %1090 }
 0x21e   : > { %1175 = vrot.lane.b32.xlu0 %v1023_v41, %s1691_s8  ;;  %1129 = vrot.lane.b32.xlu1 %v1023_v41, %s1692_s9 }
 0x220   : > { %v1170_v48 = vpop.permute.xlu1 %1169  ;;  %v1124_v22 = vpop.permute.xlu0 %1123 }
 0x222   : > { %1179 = vrot.lane.b32.xlu0 %v1038_v37, %s1691_s8  ;;  %1181 = vrot.lane.b32.xlu1 %v2052_v27, %s1691_s8 }
 0x240   : > { %v2354_v50 = vpop.permute.xlu0 %1114  ;;  %v2356_v3 = vpop.permute.xlu1 %1053 }
 0x244   : > { %v1087_v55 = vpop.permute.xlu0 %1086  ;;  %v2363_v56 = vpop.permute.xlu1 %1161 }
 0x245   : > { %v1223_v27 = vsel %vm730_vm12, %v1207_v54, %v1087_v55 }
 0x246   : > { %v1239_v57 = vsel %vm764_vm14, %v1223_v27, %v1103_v19 }
 0x248   : > { %v1120_v59 = vpop.permute.xlu0 %1119  ;;  %v1065_v0 = vpop.permute.xlu1 %1064 }
 0x249   : > { %v1209_v16 = vsel %vm696_vm10, %v1187_v11, %v1065_v0  ;;  %v1256_v39 = vsel %vm1254_vm0, %v1239_v57, %v1120_v59 }
 0x24c   : > { %v1111_v1 = vpop.permute.xlu0 %1110  ;;  %v1158_v42 = vpop.permute.xlu1 %1157 }
 0x250   : > { %v1140_v4 = vpop.permute.xlu0 %1139  ;;  %v2367_v9 = vpop.permute.xlu1 %1049 }
 0x254   : > { %v1172_v7 = vpop.permute.xlu0 %1171  ;;  %v1093_v8 = vpop.permute.xlu1 %1092 }
 0x255   : > { %v1229_v47 = vsel %vm730_vm12, %v2339_v49, %v1093_v8 }
 0x258   : > { %v1071_v53 = vpop.permute.xlu0 %1070  ;;  %v1126_v61 = vpop.permute.xlu1 %1125 }
 0x259   : > { %v1215_v49 = vsel %vm696_vm10, %v2320_v43, %v1071_v53  ;;  %v1205_v43 = vsel %vm662_vm8, %v2278_v5, %v2356_v3 }
 0x25c   : > { %v2369_v38 = vpop.permute.xlu0 %1163  ;;  %v2371_v6 = vpop.permute.xlu1 %1116 }
 0x260   : > { %v1067_v17 = vpop.permute.xlu0 %1066  ;;  %v1089_v18 = vpop.permute.xlu1 %1088 }
 0x261   : > { %v1225_v19 = vsel %vm730_vm12, %v1209_v16, %v1089_v18  ;;  %v1211_v46 = vsel %vm696_vm10, %v2328_v23, %v1067_v17  ;;  %v1245_v23 = vsel %vm764_vm14, %v1229_v47, %v2316_v25 }
 0x262   : > { %v1241_v21 = vsel %vm764_vm14, %v1225_v19, %v1105_v28  ;;  %v1227_v37 = vsel %vm730_vm12, %v1211_v46, %v1091_v51  ;;  %v1262_v52 = vsel %vm1254_vm0, %v1245_v23, %v1126_v61 }
 0x263   : > { %v1243_v58 = vsel %vm764_vm14, %v1227_v37, %v2292_v15 }
 0x264   : > { %v1136_v14 = vpop.permute.xlu0 %1135  ;;  %v1122_v34 = vpop.permute.xlu1 %1121  ;;  %v1260_v26 = vsel %vm1254_vm0, %v1243_v58, %v1124_v22 }
 0x265   : > { %v1273_v63 = vsel %vm1271_vm1, %v1256_v39, %v1136_v14  ;;  %v1258_v29 = vsel %vm1254_vm0, %v1241_v21, %v1122_v34  ;;  %v1199_v39 = vsel %vm662_vm8, %v2297_v60, %v2367_v9 }
 0x266   : > { %v1275_v20 = vsel %vm1271_vm1, %v1258_v29, %v1138_v13  ;;  %v1290_v30 = vsel %vm1288_vm2, %v1273_v63, %v1152_v2 }
 0x267   : > { %v1292_v45 = vsel %vm1288_vm2, %v1275_v20, %v2302_v12 }
 0x268   : > { %v1168_v36 = vpop.permute.xlu0 %1167  ;;  %v1113_v40 = vpop.permute.xlu1 %1112  ;;  %v1309_v33 = vsel %vm1305_vm3, %v1292_v45, %v1170_v48  ;;  %v1277_v48 = vsel %vm1271_vm1, %v1260_v26, %v1140_v4 }
 0x269   : > { %v1307_v35 = vsel %vm1305_vm3, %v1290_v30, %v1168_v36  ;;  %v1294_v15 = vsel %vm1288_vm2, %v1277_v48, %v2311_v24 }
 0x26a   : > { %v1569_v31 = vcombine.low %v1307_v35, %v1309_v33  ;;  %v1311_v25 = vsel %vm1305_vm3, %v1294_v15, %v1172_v7 }
 0x26c   : > { %1633 = vmatprep.mubr.msk.bf16.mxu1 %vm1378_vm4, %v1569_v31  ;;  %v1077_v28 = vpop.permute.xlu1 %1076  ;;  %v1052_v44 = vpop.permute.xlu0 %1051 }
 0x26d   : > { %v1221_v17 = vsel %vm696_vm10, %v1205_v43, %v1077_v28 }
 0x270   : > { %v1146_v12 = vpop.permute.xlu1 %1145  ;;  %v1160_v41 = vpop.permute.xlu0 %1159 }
 0x274   : > { %v1178_v2 = vpop.permute.xlu1 %1177  ;;  %v1099_v13 = vpop.permute.xlu0 %1098 }
 0x278   : > { %v1142_v51 = vpop.permute.xlu1 %1141  ;;  %v1132_v54 = vpop.permute.xlu0 %1131 }
 0x279   : > { %v1279_v55 = vsel %vm1271_vm1, %v1262_v52, %v1142_v51 }
 0x27a   : > { %v1296_v22 = vsel %vm1288_vm2, %v1279_v55, %v1158_v42  ;;  %v1202_v42 = vsel %vm662_vm8, %v2343_v32, %v1052_v44 }
 0x27c   : > { %v1174_v27 = vpop.permute.xlu1 %1173  ;;  %v1095_v57 = vpop.permute.xlu0 %1094 }
 0x27d   : > { %v1313_v59 = vsel %vm1305_vm3, %v1296_v22, %v1174_v27  ;;  %v1231_v0 = vsel %vm730_vm12, %v1215_v49, %v1095_v57 }
 0x27e   : > { %v1570_v4 = vcombine.low %v1311_v25, %v1313_v59  ;;  %v1247_v8 = vsel %vm764_vm14, %v1231_v0, %v1111_v1 }
 0x280   : > { %1634 = vmatmul.mubr.msk.bf16.vlgmr.msra.gmra.mxu1 %vm1378_vm4, %v1570_v4  ;;  %v1073_v61 = vpop.permute.xlu1 %1072  ;;  %v1128_v24 = vpop.permute.xlu0 %1127 }
 0x281   : > { %v1217_v3 = vsel %vm696_vm10, %v1199_v39, %v1073_v61  ;;  %v1264_v20 = vsel %vm1254_vm0, %v1247_v8, %v1128_v24 }
 0x284   : > { %v1101_v11 = vpop.permute.xlu1 %1100  ;;  %v1148_v16 = vpop.permute.xlu0 %1147 }
 0x285   : > { %v1237_v1 = vsel %vm730_vm12, %v1221_v17, %v1101_v11 }
 0x286   : > { %v1253_v21 = vsel %vm764_vm14, %v1237_v1, %v2371_v6 }
 0x288   : > { %v1134_v7 = vpop.permute.xlu1 %1133  ;;  %v1075_v53 = vpop.permute.xlu0 %1074 }
 0x289   : > { %v1219_v18 = vsel %vm696_vm10, %v1202_v42, %v1075_v53  ;;  %v1270_v63 = vsel %vm1254_vm0, %v1253_v21, %v1134_v7 }
 0x28a   : > { %v1235_v19 = vsel %vm730_vm12, %v1219_v18, %v1099_v13  ;;  %v1287_v30 = vsel %vm1271_vm1, %v1270_v63, %v2265_v62 }
 0x28b   : > { %v1251_v5 = vsel %vm764_vm14, %v1235_v19, %v2354_v50  ;;  %v1304_v62 = vsel %vm1288_vm2, %v1287_v30, %v2287_v10 }
 0x28c   : > { %v1144_v32 = vpop.permute.xlu0 %1143  ;;  %v1097_v14 = vpop.permute.xlu1 %1096  ;;  %v1268_v29 = vsel %vm1254_vm0, %v1251_v5, %v1132_v54 }
 0x28d   : > { %v1233_v34 = vsel %vm730_vm12, %v1217_v3, %v1097_v14  ;;  %v1281_v60 = vsel %vm1271_vm1, %v1264_v20, %v1144_v32  ;;  %v1285_v6 = vsel %vm1271_vm1, %v1268_v29, %v1148_v16 }
 0x28e   : > { %v1249_v50 = vsel %vm764_vm14, %v1233_v34, %v1113_v40  ;;  %v1298_v35 = vsel %vm1288_vm2, %v1281_v60, %v1160_v41  ;;  %v1302_v40 = vsel %vm1288_vm2, %v1285_v6, %v2369_v38 }
 0x290   : > { %v1176_v9 = vpop.permute.xlu0 %1175  ;;  %v1130_v45 = vpop.permute.xlu1 %1129 }
 0x291   : > { %v1266_v36 = vsel %vm1254_vm0, %v1249_v50, %v1130_v45  ;;  %v1315_v46 = vsel %vm1305_vm3, %v1298_v35, %v1176_v9 }
 0x292   : > { %v1283_v33 = vsel %vm1271_vm1, %v1266_v36, %v1146_v12 }
 0x293   : > { %v1300_v31 = vsel %vm1288_vm2, %v1283_v33, %v2363_v56 }
 0x294   : > { %v1180_v28 = vpop.permute.xlu0 %1179  ;;  %v1182_v44 = vpop.permute.xlu1 %1181  ;;  %v1317_v37 = vsel %vm1305_vm3, %v1300_v31, %v1178_v2 }
 0x295   : > { %v1319_v58 = vsel %vm1305_vm3, %v1302_v40, %v1180_v28  ;;  %v1321_v12 = vsel %vm1305_vm3, %v1304_v62, %v1182_v44  ;;  %v1571_v41 = vcombine.low %v1315_v46, %v1317_v37 }
 0x296   : > { %v1572_v47 = vcombine.low %v1319_v58, %v1321_v12 }
 0x297   : > { %1637 = vmatprep.mubr.msk.bf16.mxu1 %vm1378_vm4, %v1571_v41 }
 0x298   : > { %1638 = vmatmul.mubr.msk.bf16.gmra.mxu1 %vm1378_vm4, %v1572_v47 }
 0x340   : > { %v1635_v10 = vpop.f32.mrf.mxu1 }
 0x341   : > { %v1462_v56 = vmax.f32 %v1635_v10, 0.0 }
 0x342   : > { %v1429_v38 = vpop.f32.mrf.mxu1 }
 0x343   : > { %1470 = vst [vmem:[%s170_s26 + $0x10] sm:$0xff] %v1462_v56  ;;  %v1460_v26 = vmax.f32 %v1429_v38, 0.0 }
 0x344   : > { %v1636_v2 = vpop.f32.mrf.mxu1 }
 0x345   : > { %1468 = vst [vmem:[%s170_s26] sm:$0xff] %v1460_v26  ;;  %v1463_v13 = vmax.f32 %v1636_v2, 0.0 }
 0x346   : > { %v1432_v23 = vpop.f32.mrf.mxu1 }
 0x347   : > { %1471 = vst [vmem:[%s170_s26 + $0x18] sm:$0xff] %v1463_v13  ;;  %v1461_v48 = vmax.f32 %v1432_v23, 0.0 }
 0x349   : > { %1469 = vst [vmem:[%s170_s26 + $0x8] sm:$0xff] %v1461_v48 }
 0x358   : > { %v1639_v52 = vpop.f32.mrf.mxu1 }
 0x359   : > { %v1466_v51 = vmax.f32 %v1639_v52, 0.0 }
 0x35a   : > { %v1445_v54 = vpop.f32.mrf.mxu1 }
 0x35b   : > { %1474 = vst [vmem:[%s170_s26 + $0x30] sm:$0xff] %v1466_v51  ;;  %v1464_v55 = vmax.f32 %v1445_v54, 0.0 }
 0x35c   : > { %v1640_v15 = vpop.f32.mrf.mxu1 }
 0x35d   : > { %1472 = vst [vmem:[%s170_s26 + $0x20] sm:$0xff] %v1464_v55  ;;  %v1467_v49 = vmax.f32 %v1640_v15, 0.0 }
 0x35e   : > { %v1448_v22 = vpop.f32.mrf.mxu1 }
 0x35f   : > { %1475 = vst [vmem:[%s170_s26 + $0x38] sm:$0xff] %v1467_v49  ;;  %v1465_v27 = vmax.f32 %v1448_v22, 0.0 }
 0x361   : > { %1473 = vst [vmem:[%s170_s26 + $0x28] sm:$0xff] %v1465_v27 }
 0x362 PF: > { %s13_s12 = sadd.s32 1, %s1678_s12  }
 0x363   : > { %p10_p5 = scmp.ge.s32.totalorder %s13_s12, 4  }
 0x365   :  { %12 = sbr.rel (!%p10_p5) target bundleno = 1 (0x1), region = 62 }

</bundles_post_ra>
